<compile_context>
chip_gen: v7x
topology: tpu7x:2x2x1
jax: 0.10.0
libtpu: 0.0.40
codegen_flags: <defaults>
</compile_context>

<pallas_src>
import math
import jax
import jax.numpy as jnp
from jax.experimental import pallas as pl
from jax.experimental.pallas import tpu as pltpu


def _graph_conv_layer_kernel(gso_t_ref, w_t_ref, bias_ref, x_ref, o_ref):
    """One batch element: fused (vertex mix -> channel mix -> +bias -> +residual), NCHW-native.

    Refs:
      gso_t_ref : (N, N)          gso^T          (resident in VMEM)
      w_t_ref   : (c_out, C)      weight^T       (resident; C == c_out after Align)
      bias_ref  : (c_out, 1)                      (resident)
      x_ref     : (1, C, T*N)     aligned input slab for this batch element
      o_ref     : (1, c_out, T*N) output slab
    """
    C = x_ref.shape[1]
    P = x_ref.shape[2]
    N = gso_t_ref.shape[0]
    T = P // N

    x = x_ref[0]                                                     # (C, T*N)

    # Vertex mix: y[(c,t), h] = sum_i x[c,t,i] * gso[h,i]  -> one (C*T, N) x (N, N) GEMM.
    y = jnp.dot(x.reshape(C * T, N), gso_t_ref[...],
                preferred_element_type=jnp.float32)                  # (C*T, N)

    # Channel mix: z[j, (t,h)] = sum_c weight[c,j] * y[c, (t,h)]  -> lane-dense (c_out, T*N).
    z = jnp.dot(w_t_ref[...], y.reshape(C, P),
                preferred_element_type=jnp.float32)                  # (c_out, T*N)

    # Epilogue: bias + residual (Align output), fused with the lane-dense store.
    o_ref[0] = (z + bias_ref[...] + x).astype(o_ref.dtype)


def graph_conv_layer(x, gso, weight, bias, align_weight=None, align_bias=None):
    """Forward of STGCN GraphConvLayer with graph_conv_type='graph_conv'.

    x: (B, c_in, T, N) float32 (NCHW).  Returns (B, c_out, T, N) (NCHW), matching the module.
    """
    B, c_in, T, N = x.shape
    c_out = weight.shape[1]

    # ---- Align (thin channel-only glue; the aligned tensor is also the residual input, so it
    #      is materialized exactly as in the PyTorch module). ----
    if c_in > c_out:
        # 1x1 conv over channels (align_conv) — plain-JAX channel matmul, not part of the
        # graph-conv kernel (not exercised in the demo).
        x_gc_in = jnp.einsum('oc,bcth->both', align_weight, x)
        if align_bias is not None:
            x_gc_in = x_gc_in + align_bias.reshape(1, c_out, 1, 1)
    elif c_in < c_out:
        x_gc_in = jnp.pad(x, ((0, 0), (0, c_out - c_in), (0, 0), (0, 0)))
    else:
        x_gc_in = x

    P = T * N
    x_flat = x_gc_in.reshape(B, c_out, P)      # free row-major metadata reshape (still NCHW data)
    gso_t = gso.T                              # (N, N), tiny one-time transpose
    w_t = weight.T                             # (c_out, c_out), tiny
    bias_col = bias.reshape(c_out, 1)

    out_flat = pl.pallas_call(
        _graph_conv_layer_kernel,
        out_shape=jax.ShapeDtypeStruct((B, c_out, P), x.dtype),
        grid_spec=pltpu.PrefetchScalarGridSpec(
            num_scalar_prefetch=0,
            grid=(B,),
            in_specs=[
                pl.BlockSpec((N, N), lambda b: (0, 0)),            # gso^T   (resident)
                pl.BlockSpec((c_out, c_out), lambda b: (0, 0)),    # W^T     (resident)
                pl.BlockSpec((c_out, 1), lambda b: (0, 0)),        # bias    (resident)
                pl.BlockSpec((1, c_out, P), lambda b: (b, 0, 0)),  # aligned x, per-batch slab
            ],
            out_specs=pl.BlockSpec((1, c_out, P), lambda b: (b, 0, 0)),
        ),
        compiler_params=pltpu.CompilerParams(
            dimension_semantics=("parallel",)),   # independent batch blocks -> v7x 2-TC sharding
    )(gso_t, w_t, bias_col, x_flat)

    return out_flat.reshape(B, c_out, T, N)


def init_params(key, c_in, c_out):
    """Deterministic param init mirroring the PyTorch GraphConv shapes/init style."""
    kw, kb = jax.random.split(key)
    # kaiming_uniform_(weight, a=sqrt(5)) on a (c_in, c_out) tensor: fan_in = dim 1 (= c_out).
    a = math.sqrt(5.0)
    gain = math.sqrt(2.0 / (1.0 + a * a))
    fan_in = c_out
    w_bound = gain * math.sqrt(3.0 / fan_in)
    weight = jax.random.uniform(kw, (c_in, c_out), jnp.float32, -w_bound, w_bound)
    b_bound = 1.0 / math.sqrt(fan_in) if fan_in > 0 else 0.0
    bias = jax.random.uniform(kb, (c_out,), jnp.float32, -b_bound, b_bound)
    return weight, bias


if __name__ == "__main__":
    # Small shapes consistent with the layer: NCHW = (batch, c_in, T, n_vertex).
    # c_in < c_out exercises the Align zero-pad branch; n_vertex=128 is a realistic graph size.
    B, c_in, T, N = 2, 4, 8, 128
    c_out = 8

    key = jax.random.PRNGKey(0)
    kx, kg, kp = jax.random.split(key, 3)

    x = jax.random.normal(kx, (B, c_in, T, N), dtype=jnp.float32)
    # Graph shift operator with normalized-Laplacian-like magnitude.
    gso = jax.random.normal(kg, (N, N), dtype=jnp.float32) / jnp.sqrt(N)
    weight, bias = init_params(kp, c_out, c_out)      # GraphConv(c_out, c_out)

    out = graph_conv_layer(x, gso, weight, bias)
    out = jax.block_until_ready(out)

    # Plain-JAX reference mirroring the PyTorch GraphConvLayer forward exactly.
    x_gc_in = jnp.pad(x, ((0, 0), (0, c_out - c_in), (0, 0), (0, 0)))      # Align (c_in < c_out)
    xp = jnp.transpose(x_gc_in, (0, 2, 3, 1))                               # (B, T, N, c_out)
    first = jnp.einsum('hi,btij->bthj', gso, xp)
    second = jnp.einsum('bthi,ij->bthj', first, weight) + bias
    ref = jnp.transpose(second, (0, 3, 1, 2)) + x_gc_in                     # NCHW + residual

    assert out.shape == (B, c_out, T, N), out.shape
    err = float(jnp.max(jnp.abs(out - ref)))
    assert jnp.allclose(out, ref, atol=1e-4, rtol=1e-4), f"mismatch vs reference, max abs err={err}"

    print("KERNEL_OK")
</pallas_src>

<mosaic_0001>
module attributes {stable_mosaic.version = 11 : i64} {
  func.func @_graph_conv_layer_kernel(%arg0: i32, %arg1: memref<128x128xf32, #tpu.memory_space<vmem>>, %arg2: memref<8x8xf32, #tpu.memory_space<vmem>>, %arg3: memref<8x1xf32, #tpu.memory_space<vmem>>, %arg4: memref<1x8x1024xf32, #tpu.memory_space<vmem>>, %arg5: memref<1x8x1024xf32, #tpu.memory_space<vmem>>) attributes {dimension_semantics = [#tpu.dimension_semantics<parallel>], iteration_bounds = array<i64: 2>, scalar_prefetch = 0 : i64, scratch_operands = 0 : i64, tpu.core_type = #tpu.core_type<tc>, window_params = [{pipeline_mode = #tpu.pipeline_mode<synchronous>, transform_indices = @transform_0, window_bounds = array<i64: 128, 128>}, {pipeline_mode = #tpu.pipeline_mode<synchronous>, transform_indices = @transform_1, window_bounds = array<i64: 8, 8>}, {pipeline_mode = #tpu.pipeline_mode<synchronous>, transform_indices = @transform_2, window_bounds = array<i64: 8, 1>}, {transform_indices = @transform_3, window_bounds = array<i64: 1, 8, 1024>}, {transform_indices = @transform_4, window_bounds = array<i64: 1, 8, 1024>}]} {
    %c0 = arith.constant 0 : index
    %c0_0 = arith.constant 0 : index
    %c0_1 = arith.constant 0 : index
    %0 = vector.load %arg4[%c0, %c0_0, %c0_1] : memref<1x8x1024xf32, #tpu.memory_space<vmem>>, vector<1x8x1024xf32>
    %1 = vector.shape_cast %0 : vector<1x8x1024xf32> to vector<8x1024xf32>
    %2 = vector.shape_cast %1 : vector<8x1024xf32> to vector<64x128xf32>
    %c0_2 = arith.constant 0 : index
    %c0_3 = arith.constant 0 : index
    %3 = vector.load %arg1[%c0_2, %c0_3] : memref<128x128xf32, #tpu.memory_space<vmem>>, vector<128x128xf32>
    %cst = arith.constant dense<0.000000e+00> : vector<64x128xf32>
    %4 = tpu.matmul %2, %3, %cst {dimension_numbers = #tpu.dot_dimension_numbers<[1], [0], [0], [1], [0, 0, 1, 1], [], []>} : vector<64x128xf32>, vector<128x128xf32>, vector<64x128xf32> -> vector<64x128xf32>
    %c0_4 = arith.constant 0 : index
    %c0_5 = arith.constant 0 : index
    %5 = vector.load %arg2[%c0_4, %c0_5] : memref<8x8xf32, #tpu.memory_space<vmem>>, vector<8x8xf32>
    %6 = vector.shape_cast %4 : vector<64x128xf32> to vector<8x1024xf32>
    %cst_6 = arith.constant dense<0.000000e+00> : vector<8x1024xf32>
    %7 = tpu.matmul %5, %6, %cst_6 {dimension_numbers = #tpu.dot_dimension_numbers<[1], [0], [0], [1], [0, 0, 1, 1], [], []>} : vector<8x8xf32>, vector<8x1024xf32>, vector<8x1024xf32> -> vector<8x1024xf32>
    %c0_7 = arith.constant 0 : index
    %c0_8 = arith.constant 0 : index
    %8 = vector.load %arg3[%c0_7, %c0_8] : memref<8x1xf32, #tpu.memory_space<vmem>>, vector<8x1xf32>
    %9 = vector.broadcast %8 : vector<8x1xf32> to vector<8x1024xf32>
    %10 = arith.addf %7, %9 : vector<8x1024xf32>
    %11 = arith.addf %10, %1 : vector<8x1024xf32>
    %c0_9 = arith.constant 0 : index
    %c0_10 = arith.constant 0 : index
    %c0_11 = arith.constant 0 : index
    %12 = vector.load %arg5[%c0_9, %c0_10, %c0_11] : memref<1x8x1024xf32, #tpu.memory_space<vmem>>, vector<1x8x1024xf32>
    %13 = vector.shape_cast %12 : vector<1x8x1024xf32> to vector<8x1024xf32>
    %14 = vector.shape_cast %11 : vector<8x1024xf32> to vector<1x8x1024xf32>
    tpu.vector_store %arg5[%c0_9, %c0_10, %c0_11], %14 {strides = array<i32>} : memref<1x8x1024xf32, #tpu.memory_space<vmem>>, vector<1x8x1024xf32>,
    return
  }
  func.func @transform_0(%arg0: i32) -> (i32, i32) {
    %c0_i32 = arith.constant 0 : i32
    %c0_i32_0 = arith.constant 0 : i32
    %c0_i32_1 = arith.constant 0 : i32
    return %c0_i32, %c0_i32_0 : i32, i32
  }
  func.func @transform_1(%arg0: i32) -> (i32, i32) {
    %c0_i32 = arith.constant 0 : i32
    %c0_i32_0 = arith.constant 0 : i32
    %c0_i32_1 = arith.constant 0 : i32
    return %c0_i32, %c0_i32_0 : i32, i32
  }
  func.func @transform_2(%arg0: i32) -> (i32, i32) {
    %c0_i32 = arith.constant 0 : i32
    %c0_i32_0 = arith.constant 0 : i32
    %c0_i32_1 = arith.constant 0 : i32
    return %c0_i32, %c0_i32_0 : i32, i32
  }
  func.func @transform_3(%arg0: i32) -> (i32, i32, i32) {
    %c0_i32 = arith.constant 0 : i32
    %c0_i32_0 = arith.constant 0 : i32
    %c0_i32_1 = arith.constant 0 : i32
    return %arg0, %c0_i32, %c0_i32_0 : i32, i32, i32
  }
  func.func @transform_4(%arg0: i32) -> (i32, i32, i32) {
    %c0_i32 = arith.constant 0 : i32
    %c0_i32_0 = arith.constant 0 : i32
    %c0_i32_1 = arith.constant 0 : i32
    return %arg0, %c0_i32, %c0_i32_0 : i32, i32, i32
  }
}

</mosaic_0001>

<bundles_post_ra>
// kernel: tpu_custom_call.1
= control target key start
LH: loop header
LB: loop body
LE: loop exit
PB: predicated region body
PF: predicated region fallthrough
CT: control target
= control target key end

     0   :  { %9 = vsyncpa [#allocation3], 0  ;;  %s1724_s0 = inlined_call_operand.hbm [shape: f32[128,128], index: 0, kind: input, shape index: {}]   ;;  %s1725_s1 = inlined_call_operand.vmem [shape: f32[8,8], index: 1, kind: input, shape index: {}]   ;;  %s1726_s2 = inlined_call_operand.vmem [shape: f32[8,1], index: 2, kind: input, shape index: {}]   ;;  %s1727_s3 = inlined_call_operand.hbm [shape: f32[2,8,1024], index: 3, kind: input, shape index: {}]   ;;  %s1728_s4 = inlined_call_operand.hbm [shape: f32[2,8,1024], index: 4, kind: output, shape index: {}]  }
   0x1   :  { %10 = vsyncpa [#allocation6], 0 }
   0x2   :  { %12 = vsyncpa [#allocation6 + $0x1], 0 }
   0x3   :  { %13 = vsyncpa [#allocation4], 0 }
   0x4   :  { %15 = vsyncpa [#allocation4 + $0x1], 0  ;;  %s1426_s15 = smov 0   ;;  %s1428_s16 = smov 0  }
   0x5   :  { %s1430_s17 = smov 0   ;;  %s1432_s18 = smov 0  }
   0x6 LB: > { %s1447_s19 = sadd.s32 4294967295, %s1391_s18   ;;  %s1070_s20 = sadd.s32 4294967294, %s1391_s18   ;;  %s1391_s18 = sphi %s1432_s18, %s1748_s18   ;;  %s1387_s17 = sphi %s1430_s17, %s1747_s17   ;;  %s1383_s16 = sphi %s1428_s16, %s1746_s16   ;;  %s1379_s15 = sphi %s1426_s15, %s1745_s15  }
   0x7   : > { %p104_p0 = scmp.ne.s32.totalorder %s1383_s16, %s1379_s15  ;;  %p1729_p1 = scmp.eq.s32.totalorder %s1447_s19, 0 }
   0x8   : > { %p134_p3 = scmp.eq.s32.totalorder %s1070_s20, 1  ;;  %p1071_p5 = scmp.ge.s32.totalorder %s1391_s18, 1 }
   0x9   : > { %p1456_p4 = por %p1729_p1, %p104_p0  ;;  %p141_p7 = scmp.lt.s32.totalorder %s1391_s18, 3 }
   0xa   : > { %p1461_p6 = por %p134_p3, %p104_p0  ;;  %s1393_s24 = smov [#allocation2]  }
   0xb   : > { %s1732_s21 = scalar_select %p1456_p4, 1, 0 }
   0xc   : > { %s1733_s22 = scalar_select %p1461_p6, 1, 0 }
   0xd   : > { %p1466_p8 = pnand %p1071_p5, %p141_p7  ;;  %s153_s25 = sshll.u32 %s1393_s24, 4  ;;  %s1470_s25 = int_to_ptr.vmem [resolvable:$true] %s153_s25 }
   0xe   : > { %s1482_s27 = sadd.s32 1, %s1391_s18   ;;  %s91_s28 = sadd.s32 1, %s1387_s17 }
   0xf   : > { %s1734_s23 = scalar_select %p1466_p8, 1, 0 }
  0x10   : > { %p1200_p9 = pneg %p1466_p8  ;;  %s88_s29 = ssub.s32 %s1391_s18, %s1482_s27 }
  0x11   : > { %s1263_s6 = scalar_lea.hbm %s1724_s0, 2048 }
  0x12   : > { %p1477_p11 = pnand %p1200_p9, %p1729_p1  ;;  %p1264_p12 = scmp.ne.s32.totalorder %s1724_s0, %s1263_s6 }
  0x13   : > { %p1270_p5 = scmp.lt.u32.totalorder %s1263_s6, %s1724_s0 }
  0x14   : > { %p1265_p13 = pneg %p1477_p11 }
  0x16   : > { %p1266_p0 = pnand %p1265_p13, %p1264_p12 }
  0x18   : > { %p1267_p3 = pneg %p1266_p0 }
  0x1a   : > { %p1272_p7 = pnand %p1270_p5, %p1267_p3 }
  0x1c   : > { %1275 = shalt.err (!%p1272_p7)
}
  0x1d   : > { %s1276_s11 = scalar_lea.vmem %s1470_s25, 2048  ;;  %p1284_p2 = scmp.lt.s32.totalorder %s1470_s25, %s1470_s25 }
  0x1e   : > { %p1277_p9 = scmp.ne.s32.totalorder %s1470_s25, %s1276_s11  ;;  %p1285_p6 = scmp.lt.s32.totalorder %s1276_s11, %s1276_s11 }
  0x20   : > { %p1279_p10 = pnand %p1277_p9, %p1265_p13  ;;  %p1286_p4 = por %p1285_p6, %p1284_p2 }
  0x22   : > { %p1280_p1 = pneg %p1279_p10 }
  0x24   : > { %p1287_p8 = pnand %p1286_p4, %p1280_p1 }
  0x26   : > { %1290 = shalt.err (!%p1287_p8)
}
  0x27   : > { %s1394_s12 = smov 128   ;;  %s1395_s13 = smov 8  }
  0x28   : > { %1203 = dma.hbm_to_vmem [thread:$0]  (!%p1477_p11), %s1724_s0, 2048, %s1470_s25, [#allocation3], %s1394_s12, %s1394_s12, %s1395_s13  }
  0x29   : > { %p89_p2 = scmp.eq.s32.totalorder %s88_s29, 0  ;;  %p98_p1 = scmp.ne.s32.totalorder %s1387_s17, %s1383_s16 }
  0x2a   : > { %p99_p4 = scmp.eq.s32.totalorder %s1391_s18, 0  ;;  %p1213_p6 = scmp.lt.s32.totalorder %s1391_s18, 2 }
  0x2b   : > { %s1513_s24 = scalar_select %p89_p2, %s1387_s17, %s91_s28  }
  0x2c   : > { %p100_p8 = por %p99_p4, %p98_p1  ;;  %p1736_p10 = scmp.eq.s32.totalorder %s1447_s19, 1 }
  0x2d   : > { %s173_s5 = sand.u32 1, %s1387_s17   ;;  %s1090_s6 = sshll.u32 %s1391_s18, 10 }
  0x2e   : > { %p1517_p12 = por %p1736_p10, %p98_p1  ;;  %s1074_s7 = sshll.u32 %s173_s5, 6 }
  0x2f   : > { %s1526_s9 = scalar_lea.hbm %s1727_s3, %s1090_s6  ;;  %s177_s25 = scalar_lea.vmem [#allocation5], %s1074_s7 }
  0x30   : > { %s185_s28 = sshll.u32 %s177_s25, 4  ;;  %p1528_p11 = pnand %p1213_p6, %p100_p8  ;;  %s1532_s28 = int_to_ptr.vmem [resolvable:$true] %s185_s28 }
  0x31   : > { %s174_s10 = scalar_lea.sflag [#allocation6], %s173_s5  ;;  %s1291_s11 = scalar_lea.hbm %s1526_s9, 1024 }
  0x32   : > { %p1292_p13 = scmp.ne.s32.totalorder %s1526_s9, %s1291_s11  ;;  %p1293_p0 = pneg %p1528_p11 }
  0x33   : > { %s1296_s14 = scalar_lea.hbm %s1727_s3, 2048  ;;  %p1297_p7 = scmp.lt.u32.totalorder %s1526_s9, %s1727_s3 }
  0x34   : > { %p1294_p3 = pnand %p1293_p0, %p1292_p13  ;;  %p1298_p9 = scmp.lt.u32.totalorder %s1296_s14, %s1291_s11 }
  0x35   : > { %p1300_p1 = scmp.lt.u32.totalorder %s1291_s11, %s1526_s9 }
  0x36   : > { %p1295_p5 = pneg %p1294_p3  ;;  %p1299_p2 = por %p1298_p9, %p1297_p7 }
  0x38   : > { %p1301_p4 = por %p1300_p1, %p1299_p2 }
  0x3a   : > { %p1302_p6 = pnand %p1301_p4, %p1295_p5 }
  0x3c   : > { %1305 = shalt.err (!%p1302_p6)
}
  0x3d   : > { %s1306_s5 = scalar_lea.vmem %s1532_s28, 1024  ;;  %s1396_s7 = smov [#allocation5]  }
  0x3e   : > { %p1307_p8 = scmp.ne.s32.totalorder %s1532_s28, %s1306_s5  ;;  %s1311_s26 = sshll.u32 %s1396_s7, 4  ;;  %s1312_s26 = int_to_ptr.vmem [resolvable:$false] %s1311_s26 }
  0x3f   : > { %s1313_s8 = scalar_lea.vmem %s1312_s26, 2048  ;;  %p1314_p3 = scmp.lt.s32.totalorder %s1532_s28, %s1312_s26 }
  0x40   : > { %p1309_p10 = pnand %p1307_p8, %p1293_p0  ;;  %p1315_p7 = scmp.lt.s32.totalorder %s1313_s8, %s1306_s5 }
  0x42   : > { %p1310_p13 = pneg %p1309_p10  ;;  %p1316_p9 = por %p1315_p7, %p1314_p3 }
  0x44   : > { %p1317_p2 = pnand %p1316_p9, %p1310_p13 }
  0x46   : > { %1320 = shalt.err (!%p1317_p2)
}
  0x47   : > { %1207 = dma.hbm_to_vmem [thread:$0]  (!%p1528_p11), %s1526_s9, 1024, %s1532_s28, %s174_s10  }
  0x48   : > { %p1739_p5 = scmp.ne.s32.totalorder %s1734_s23, 0 }
  0x49   : > { %p1740_p0 = scmp.eq.s32.totalorder (!%p1739_p5), %s1447_s19, 0 }
  0x4a   : > { %194 = sbr.rel (%p1739_p5) target bundleno = 601 (0x259), region = 36 }
  0x51   : > { %1366 = dma.done.wait (%p1740_p0), [#allocation3], 2048   ;;  %p1741_p1 = pmov %p1740_p0 }
  0x52   : > { %s1566_s25 = sand.u32 1, %s1383_s16   ;;  %p1742_p11 = scmp.ne.s32.totalorder %s1732_s21, 0 }
  0x53   : > { %1368 = vsyncadd (%p1741_p1), [#allocation3], 4294965248  ;;  %s1079_s29 = sshll.u32 %s1566_s25, 6  ;;  %s201_s11 = scalar_lea.sflag [#allocation6], %s1566_s25 }
  0x54   : > { %s1572_s9 = scalar_lea.vmem [#allocation5], %s1079_s29 }
  0x55   : > { %1370 = dma.done.wait (%p1742_p11), %s201_s11, 1024  }
  0x56   : > { %1372 = vsyncadd (%p1742_p11), %s201_s11, 4294966272  ;;  %v1397_v0 = vmov 1966171168   ;;  %v256_v2 = vlaneseq  ;;  %v389_v3 = vld [vmem:[#allocation2] sm:$0xff]  ;;  %v390_v4 = vld [vmem:[#allocation2 + $0x8] sm:$0xff]  ;;  %vm669_vm0 = vcmask 64512  }
  0x57   : > { %v254_v1 = vunpack.c.l.s4 %v1397_v0  ;;  %v391_v5 = vld [vmem:[#allocation2 + $0x10] sm:$0xff]  ;;  %v1160_v8 = vpack.c.bf16 %v390_v4, %v389_v3  ;;  %v392_v9 = vld [vmem:[#allocation2 + $0x18] sm:$0xff]  ;;  %v393_v11 = vld [vmem:[#allocation2 + $0x20] sm:$0xff]  ;;  %s228_s12 = scalar_lea.vmem [#allocation7], %s1079_s29  ;;  %s1091_s13 = sshll.u32 %s1447_s19, 10 }
  0x58   : > { %v257_v7 = vshrl.u32 %v256_v2, 7  ;;  %v1164_v10 = vpack.c.bf16 %v392_v9, %v391_v5  ;;  %v394_v12 = vld [vmem:[#allocation2 + $0x28] sm:$0xff]  ;;  %v395_v13 = vld [vmem:[#allocation2 + $0x30] sm:$0xff]  ;;  %v396_v16 = vld [vmem:[#allocation2 + $0x38] sm:$0xff]  ;;  %s988_s14 = sshll.u32 %s228_s12, 4  ;;  %s1680_s5 = scalar_lea.hbm %s1728_s4, %s1091_s13  ;;  %s1682_s14 = int_to_ptr.vmem [resolvable:$true] %s988_s14 }
  0x59   : > { %v255_v6 = vunpack.c.0.s8 %v254_v1  ;;  %1161 = vmatprep.subr.bf16.mxu0 %v1160_v8  ;;  %v1168_v15 = vpack.c.bf16 %v394_v12, %v393_v11  ;;  %v1581_v17 = vld [vmem:[%s1572_s9] sm:$0xff]  ;;  %v1584_v18 = vld [vmem:[%s1572_s9 + $0x8] sm:$0xff]  ;;  %v1587_v19 = vld [vmem:[%s1572_s9 + $0x10] sm:$0xff]  ;;  %v1172_v30 = vpack.c.bf16 %v396_v16, %v395_v13  ;;  %s974_s19 = scalar_lea.sflag [#allocation4], %s1566_s25  ;;  %s1321_s7 = scalar_lea.vmem %s1682_s14, 1024 }
  0x5a   : > { %1163 = vmatpush3.bf16.msra.mxu0 %v1160_v8  ;;  %v1590_v20 = vld [vmem:[%s1572_s9 + $0x18] sm:$0xff]  ;;  %v1593_v21 = vld [vmem:[%s1572_s9 + $0x20] sm:$0xff]  ;;  %v245_v22 = vcombine.low %v1581_v17, %v1584_v18  ;;  %v1598_v23 = vld [vmem:[%s1572_s9 + $0x28] sm:$0xff]  ;;  %v246_v47 = vcombine.high %v1581_v17, %v1584_v18  ;;  %p1322_p4 = scmp.ne.s32.totalorder %s1682_s14, %s1321_s7  ;;  %s1400_s26 = smov [#allocation7]  }
  0x5b   : > { %v1578_v14 = vsub.s32 %v255_v6, %v257_v7  ;;  %1165 = vmatprep.subr.bf16.mxu0 %v1164_v10  ;;  %v1601_v24 = vld [vmem:[%s1572_s9 + $0x30] sm:$0xff]  ;;  %v1604_v25 = vld [vmem:[%s1572_s9 + $0x38] sm:$0xff]  ;;  %v247_v26 = vcombine.low %v1587_v19, %v1590_v20  ;;  %v249_v27 = vcombine.low %v1593_v21, %v1598_v23  ;;  %v397_v32 = vld [vmem:[#allocation2 + $0x40] sm:$0xff]  ;;  %v248_v48 = vcombine.high %v1587_v19, %v1590_v20  ;;  %s1325_s8 = sshll.u32 %s1400_s26, 4  ;;  %s1326_s8 = int_to_ptr.vmem [resolvable:$false] %s1325_s8 }
  0x5c   : > { %v251_v28 = vcombine.low %v1601_v24, %v1604_v25  ;;  %v398_v33 = vld [vmem:[#allocation2 + $0x48] sm:$0xff]  ;;  %v399_v40 = vld [vmem:[#allocation2 + $0x50] sm:$0xff]  ;;  %v400_v41 = vld [vmem:[#allocation2 + $0x58] sm:$0xff]  ;;  %v250_v49 = vcombine.high %v1593_v21, %v1598_v23  ;;  %v252_v50 = vcombine.high %v1601_v24, %v1604_v25  ;;  %p1323_p6 = pnand %p1322_p4, %p1517_p12  ;;  %s1327_s29 = scalar_lea.vmem %s1326_s8, 2048 }
  0x5d   : > { %v259_v29 = vrot.slane %v245_v22, %v1578_v14  ;;  %v273_v31 = vrot.slane %v247_v26, %v1578_v14  ;;  %v287_v34 = vrot.slane %v249_v27, %v1578_v14  ;;  %v1176_v38 = vpack.c.bf16 %v398_v33, %v397_v32  ;;  %v401_v45 = vld [vmem:[#allocation2 + $0x60] sm:$0xff]  ;;  %v402_v46 = vld [vmem:[#allocation2 + $0x68] sm:$0xff]  ;;  %v403_v52 = vld [vmem:[#allocation2 + $0x70] sm:$0xff]  ;;  %p1328_p10 = scmp.lt.s32.totalorder %s1682_s14, %s1326_s8  ;;  %p1329_p13 = scmp.lt.s32.totalorder %s1327_s29, %s1321_s7 }
  0x5e   : > { %1167 = vmatpush3.bf16.msra.mxu0 %v1164_v10  ;;  %v301_v35 = vrot.slane %v251_v28, %v1578_v14  ;;  %v1180_v44 = vpack.c.bf16 %v400_v41, %v399_v40  ;;  %v1184_v51 = vpack.c.bf16 %v402_v46, %v401_v45  ;;  %v404_v53 = vld [vmem:[#allocation2 + $0x78] sm:$0xff]  ;;  %v266_v56 = vrot.slane %v246_v47, %v1578_v14  ;;  %v511_v16 = vld [vmem:[%s1726_s2] sm:$0xff]  ;;  %p1324_p8 = pneg %p1323_p6 }
  0x5f   : > { %1169 = vmatprep.subr.bf16.mxu0 %v1168_v15  ;;  %v309_v36 = vcombine.low %v259_v29, %v273_v31  ;;  %v310_v54 = vcombine.high %v259_v29, %v273_v31  ;;  %v280_v57 = vrot.slane %v248_v48, %v1578_v14  ;;  %v294_v58 = vrot.slane %v250_v49, %v1578_v14  ;;  %p1330_p3 = por %p1329_p13, %p1328_p10 }
  0x60   : > { %v313_v37 = vcombine.low %v287_v34, %v301_v35  ;;  %v314_v55 = vcombine.high %v287_v34, %v301_v35  ;;  %v308_v59 = vrot.slane %v252_v50, %v1578_v14  ;;  %v1188_v60 = vpack.c.bf16 %v404_v53, %v403_v52 }
  0x61   : > { %v323_v39 = vrot.slane %v309_v36, %v1578_v14  ;;  %v337_v61 = vrot.slane %v310_v54, %v1578_v14  ;;  %v311_v63 = vcombine.low %v266_v56, %v280_v57  ;;  %v312_v2 = vcombine.high %v266_v56, %v280_v57  ;;  %p1331_p7 = pnand %p1330_p3, %p1324_p8 }
  0x62   : > { %1171 = vmatpush3.bf16.msra.mxu0 %v1168_v15  ;;  %v351_v42 = vrot.slane %v313_v37, %v1578_v14  ;;  %v365_v62 = vrot.slane %v314_v55, %v1578_v14  ;;  %v315_v0 = vcombine.low %v294_v58, %v308_v59  ;;  %v316_v3 = vcombine.high %v294_v58, %v308_v59 }
  0x63   : > { %1173 = vmatprep.subr.bf16.mxu0 %v1172_v30  ;;  %v330_v5 = vrot.slane %v311_v63, %v1578_v14  ;;  %v344_v8 = vrot.slane %v312_v2, %v1578_v14  ;;  %v1398_v15 = vmov 0.0   ;;  %v1399_v22 = vmov 0  }
  0x64   : > { %v373_v43 = vcombine.low %v323_v39, %v351_v42  ;;  %v377_v1 = vcombine.low %v337_v61, %v365_v62  ;;  %v374_v4 = vcombine.high %v323_v39, %v351_v42  ;;  %v358_v6 = vrot.slane %v315_v0, %v1578_v14  ;;  %737 = vmatprep.mubr.f32.mxu1 %v1398_v15 }
  0x65   : > { %v378_v7 = vcombine.high %v337_v61, %v365_v62  ;;  %v372_v9 = vrot.slane %v316_v3, %v1578_v14  ;;  %1254 = vset.pattern.permute.xlu0 %v1399_v22 }
  0x66   : > { %1175 = vmatpush3.bf16.msra.mxu0 %v1172_v30  ;;  %1148 = vmatprep.mubr.f32.mxu0 %v373_v43  ;;  %v375_v10 = vcombine.low %v330_v5, %v358_v6  ;;  %v376_v12 = vcombine.high %v330_v5, %v358_v6  ;;  %v510_v6 = vld [vmem:[%s1725_s1] sm:$0xff] }
  0x67   : > { %1177 = vmatprep.subr.bf16.mxu0 %v1176_v38  ;;  %v379_v11 = vcombine.low %v344_v8, %v372_v9  ;;  %v380_v13 = vcombine.high %v344_v8, %v372_v9  ;;  %514 = vperm.xlu0 %1254, %v511_v16  }
  0x6a   : > { %1179 = vmatpush3.bf16.msra.mxu0 %v1176_v38 }
  0x6b   : > { %1181 = vmatprep.subr.bf16.mxu0 %v1180_v44 }
  0x6e   : > { %1183 = vmatpush3.bf16.msra.mxu0 %v1180_v44 }
  0x6f   : > { %1185 = vmatprep.subr.bf16.mxu0 %v1184_v51 }
  0x72   : > { %1187 = vmatpush3.bf16.msra.mxu0 %v1184_v51 }
  0x73   : > { %1189 = vmatprep.subr.bf16.mxu0 %v1188_v60 }
  0x76   : > { %1191 = vmatpush3.bf16.msra.mxu0 %v1188_v60 }
  0x79   : > { %1149 = vmatmul.mubr.f32.vlgmr.msra.gmra.mrb[0].mxu0 %v377_v1 }
  0x7a   : > { %1151 = vmatprep.mubr.f32.mxu0 %v374_v4 }
  0x7d   : > { %1152 = vmatmul.mubr.f32.gmra.mrb[2].mxu0 %v378_v7 }
  0x7e   : > { %1154 = vmatprep.mubr.f32.mxu0 %v375_v10 }
  0x81   : > { %1155 = vmatmul.mubr.f32.gmra.mrb[4].mxu0 %v379_v11 }
  0x82   : > { %1157 = vmatprep.mubr.f32.mxu0 %v376_v12 }
  0x85   : > { %1158 = vmatmul.mubr.f32.gmra.mrb[6].mxu0 %v380_v13 }
 0x14c   : > { %v1150_v26 = vpop.f32.mrb[0].mxu0 }
 0x14d   : > { %v471_v27 = vpop.f32.mrb[1].mxu0 }
 0x14e   : > { %v525_v28 = vcombine.low %v471_v27, %v1150_v26  ;;  %v526_v29 = vcombine.high %v471_v27, %v1150_v26 }
 0x150   : > { %v1153_v30 = vpop.f32.mrb[2].mxu0  ;;  %v546_v34 = vrot.slane %v526_v29, %v1578_v14  ;;  %v539_v38 = vrot.slane %v525_v28, %v1578_v14 }
 0x151   : > { %v481_v31 = vpop.f32.mrb[3].mxu0 }
 0x152   : > { %v527_v32 = vcombine.low %v481_v31, %v1153_v30  ;;  %v528_v33 = vcombine.high %v481_v31, %v1153_v30 }
 0x154   : > { %v553_v35 = vrot.slane %v527_v32, %v1578_v14  ;;  %v560_v36 = vrot.slane %v528_v33, %v1578_v14  ;;  %v1156_v37 = vpop.f32.mrb[4].mxu0 }
 0x155   : > { %v491_v39 = vpop.f32.mrb[5].mxu0 }
 0x156   : > { %v591_v40 = vcombine.low %v546_v34, %v560_v36  ;;  %v592_v41 = vcombine.high %v546_v34, %v560_v36  ;;  %v529_v42 = vcombine.low %v491_v39, %v1156_v37  ;;  %v530_v43 = vcombine.high %v491_v39, %v1156_v37 }
 0x157   : > { %v590_v44 = vcombine.high %v539_v38, %v553_v35  ;;  %v589_v45 = vcombine.low %v539_v38, %v553_v35 }
 0x158   : > { %v1159_v46 = vpop.f32.mrb[6].mxu0  ;;  %v567_v50 = vrot.slane %v529_v42, %v1578_v14  ;;  %v574_v51 = vrot.slane %v530_v43, %v1578_v14  ;;  %v610_v0 = vrot.slane %v591_v40, %v1578_v14  ;;  %v624_v1 = vrot.slane %v592_v41, %v1578_v14 }
 0x159   : > { %v501_v47 = vpop.f32.mrb[7].mxu0  ;;  %v617_v58 = vrot.slane %v590_v44, %v1578_v14  ;;  %v603_v59 = vrot.slane %v589_v45, %v1578_v14 }
 0x15a   : > { %v531_v48 = vcombine.low %v501_v47, %v1159_v46  ;;  %v532_v49 = vcombine.high %v501_v47, %v1159_v46 }
 0x15c   : > { %v581_v52 = vrot.slane %v531_v48, %v1578_v14  ;;  %v588_v53 = vrot.slane %v532_v49, %v1578_v14 }
 0x15e   : > { %v593_v54 = vcombine.low %v567_v50, %v581_v52  ;;  %v595_v55 = vcombine.low %v574_v51, %v588_v53  ;;  %v596_v56 = vcombine.high %v574_v51, %v588_v53  ;;  %v594_v57 = vcombine.high %v567_v50, %v581_v52 }
 0x160   : > { %v638_v60 = vrot.slane %v595_v55, %v1578_v14  ;;  %v645_v61 = vrot.slane %v594_v57, %v1578_v14  ;;  %v631_v62 = vrot.slane %v593_v54, %v1578_v14  ;;  %v652_v63 = vrot.slane %v596_v56, %v1578_v14  ;;  %v515_v14 = vpop.permute.xlu0 %514 }
 0x162   : > { %v657_v2 = vcombine.low %v617_v58, %v645_v61  ;;  %v653_v3 = vcombine.low %v603_v59, %v631_v62  ;;  %v654_v4 = vcombine.high %v603_v59, %v631_v62  ;;  %v658_v5 = vcombine.high %v617_v58, %v645_v61 }
 0x163   : > { %v659_v7 = vcombine.low %v624_v1, %v652_v63  ;;  %v655_v8 = vcombine.low %v610_v0, %v638_v60  ;;  %v660_v9 = vcombine.high %v624_v1, %v652_v63  ;;  %v656_v10 = vcombine.high %v610_v0, %v638_v60 }
 0x164   : > { %673 = vmatprep.subr.mxu1 %v657_v2 }
 0x165   : > { %674 = vmatpush1.msra.mxu1 %v653_v3 }
 0x166   : > { %1081 = vmatmul.mubr.msk.f32.vlgmr.msra.gmra.mrb[0].mxu1 %vm669_vm0, %v510_v6  ;;  %744 = vmatprep.subr.mxu1 %v658_v5 }
 0x167   : > { %745 = vmatpush1.msra.mxu1 %v654_v4  ;;  %808 = vmatprep.mubr.f32.mxu1 %v1398_v15 }
 0x168   : > { %815 = vmatprep.subr.mxu1 %v659_v7 }
 0x16a   : > { %1082 = vmatmul.mubr.msk.f32.vlgmr.msra.gmra.mrb[2].mxu1 %vm669_vm0, %v510_v6 }
 0x16b   : > { %816 = vmatpush1.msra.mxu1 %v655_v8  ;;  %879 = vmatprep.mubr.f32.mxu1 %v1398_v15 }
 0x16c   : > { %886 = vmatprep.subr.mxu1 %v660_v9 }
 0x16e   : > { %1083 = vmatmul.mubr.msk.f32.vlgmr.msra.gmra.mrb[4].mxu1 %vm669_vm0, %v510_v6 }
 0x16f   : > { %887 = vmatpush1.msra.mxu1 %v656_v10  ;;  %950 = vmatprep.mubr.f32.mxu1 %v1398_v15 }
 0x172   : > { %1084 = vmatmul.mubr.msk.f32.vlgmr.msra.gmra.mrb[6].mxu1 %vm669_vm0, %v510_v6 }
 0x239   : > { %v739_v11 = vpop.f32.mrb[0].mxu1 }
 0x23a   : > { %v740_v12 = vadd.f32 %v739_v11, %v515_v14  ;;  %v741_v13 = vpop.f32.mrb[1].mxu1 }
 0x23b   : > { %v742_v16 = vadd.f32 %v741_v13, %v515_v14 }
 0x23c   : > { %v957_v22 = vadd.f32 %v740_v12, %v1581_v17 }
 0x23d   : > { %v958_v26 = vadd.f32 %v742_v16, %v1584_v18  ;;  %v810_v27 = vpop.f32.mrb[2].mxu1 }
 0x23e   : > { %965 = vst [vmem:[%s228_s12] sm:$0xff] %v957_v22  ;;  %v811_v28 = vadd.f32 %v810_v27, %v515_v14  ;;  %v812_v29 = vpop.f32.mrb[3].mxu1 }
 0x23f   : > { %966 = vst [vmem:[%s228_s12 + $0x8] sm:$0xff] %v958_v26  ;;  %v813_v15 = vadd.f32 %v812_v29, %v515_v14 }
 0x240   : > { %v959_v30 = vadd.f32 %v811_v28, %v1587_v19 }
 0x241   : > { %v960_v31 = vadd.f32 %v813_v15, %v1590_v20  ;;  %v881_v32 = vpop.f32.mrb[4].mxu1 }
 0x242   : > { %967 = vst [vmem:[%s228_s12 + $0x10] sm:$0xff] %v959_v30  ;;  %v882_v33 = vadd.f32 %v881_v32, %v515_v14  ;;  %v883_v34 = vpop.f32.mrb[5].mxu1 }
 0x243   : > { %968 = vst [vmem:[%s228_s12 + $0x18] sm:$0xff] %v960_v31  ;;  %v884_v17 = vadd.f32 %v883_v34, %v515_v14 }
 0x244   : > { %v961_v18 = vadd.f32 %v882_v33, %v1593_v21 }
 0x245   : > { %v962_v35 = vadd.f32 %v884_v17, %v1598_v23  ;;  %v952_v36 = vpop.f32.mrb[6].mxu1 }
 0x246   : > { %969 = vst [vmem:[%s228_s12 + $0x20] sm:$0xff] %v961_v18  ;;  %v953_v37 = vadd.f32 %v952_v36, %v515_v14  ;;  %v954_v38 = vpop.f32.mrb[7].mxu1 }
 0x247   : > { %970 = vst [vmem:[%s228_s12 + $0x28] sm:$0xff] %v962_v35  ;;  %v955_v19 = vadd.f32 %v954_v38, %v515_v14 }
 0x248   : > { %v963_v20 = vadd.f32 %v953_v37, %v1601_v24 }
 0x249   : > { %v964_v39 = vadd.f32 %v955_v19, %v1604_v25 }
 0x24a   : > { %971 = vst [vmem:[%s228_s12 + $0x30] sm:$0xff] %v963_v20 }
 0x24b   : > { %972 = vst [vmem:[%s228_s12 + $0x38] sm:$0xff] %v964_v39 }
 0x24c   : > { %1334 = shalt.err (!%p1331_p7)
}
 0x24d   : > { %s1335_s25 = scalar_lea.hbm %s1680_s5, 1024  ;;  %s1339_s21 = scalar_lea.hbm %s1728_s4, 2048 }
 0x24e   : > { %p1336_p9 = scmp.ne.s32.totalorder %s1680_s5, %s1335_s25  ;;  %p1340_p0 = scmp.lt.u32.totalorder %s1680_s5, %s1728_s4 }
 0x24f   : > { %p1341_p1 = scmp.lt.u32.totalorder %s1339_s21, %s1335_s25  ;;  %p1343_p4 = scmp.lt.u32.totalorder %s1335_s25, %s1680_s5 }
 0x250   : > { %p1337_p2 = pnand %p1336_p9, %p1517_p12 }
 0x251   : > { %p1342_p11 = por %p1341_p1, %p1340_p0 }
 0x252   : > { %p1338_p5 = pneg %p1337_p2 }
 0x253   : > { %p1344_p6 = por %p1343_p4, %p1342_p11 }
 0x255   : > { %p1345_p8 = pnand %p1344_p6, %p1338_p5 }
 0x257   : > { %1348 = shalt.err (!%p1345_p8)
}
 0x258   : > { %1198 = dma.vmem_to_hbm [thread:$0]  (%p1517_p12), %s1682_s14, 1024, %s1680_s5, %s974_s19  }
 0x259 PF: > { %s1000_s10 = sand.u32 1, %s1379_s15   ;;  %p1743_p10 = scmp.ne.s32.totalorder %s1733_s22, 0 }
 0x25a   : > { %p1744_p13 = scmp.ge.s32.totalorder %s1391_s18, 2  ;;  %s1001_s12 = scalar_lea.sflag [#allocation4], %s1000_s10 }
 0x25c   : > { %p1209_p3 = pnand %p1744_p13, %p1743_p10 }
 0x25e   : > { %1374 = dma.done.wait (!%p1209_p3), %s1001_s12, 1024  }
 0x25f   : > { %1376 = vsyncadd (!%p1209_p3), %s1001_s12, 4294966272  ;;  %p18_p7 = scmp.ge.s32.totalorder %s1482_s27, 4   ;;  %s1745_s15 = smov %s1383_s16 }
 0x260   : > { %s1746_s16 = smov %s1387_s17  ;;  %s1747_s17 = smov %s1513_s24 }
 0x261   : > { %s1748_s18 = smov %s1482_s27  ;;  %20 = sbr.rel (!%p18_p7) target bundleno = 6 (0x6), region = 86 }
 0x268   :  { %1006 = vsyncpa [#allocation3], 1 }
 0x269   :  { %1008 = vsyncpa [#allocation3 + $0x1], 1 }
 0x26a   :  { %1009 = vsyncpa [#allocation6], 1 }
 0x26b   :  { %1011 = vsyncpa [#allocation6 + $0x1], 1 }
 0x26c   :  { %1012 = vsyncpa [#allocation4], 1 }
 0x26d   :  { %1014 = vsyncpa [#allocation4 + $0x1], 1 }

</bundles_post_ra>
